<compile_context>
chip_gen: v5e
topology: v5e:2x2
jax: 0.10.0
libtpu: 0.0.40
codegen_flags: <defaults>
</compile_context>

<pallas_src>
import functools

import jax
import jax.numpy as jnp
from jax.experimental import pallas as pl
from jax.experimental.pallas import tpu as pltpu


def actor_critic_kernel(xt_ref, w1t_ref, b1t_ref, w23t_ref, b23t_ref, out_ref, *,
                        action_dim):
    xt = xt_ref[...]                                        # (D, TB) lane-dense batch
    w1t = w1t_ref[...]                                      # (H, D)
    d = xt.shape[0]

    # Shared layer: hT = relu(W1^T @ xT + b1^T) as D broadcast FMAs on the VPU
    # (contraction depth D=4 would waste a full MXU pass + result-path pop).
    ht = b1t_ref[...] + w1t[:, 0:1] * xt[0:1, :]            # (H, TB)
    for k in range(1, d):
        ht = ht + w1t[:, k:k + 1] * xt[k:k + 1, :]
    ht = jnp.maximum(ht, 0.0)

    # Fused actor+critic head: one MXU pass -> (A+1, TB); rows [0, A) = logits,
    # row A = critic value.
    yt = jnp.dot(w23t_ref[...], ht, preferred_element_type=jnp.float32)
    yt = yt + b23t_ref[...]                                 # (A+1, TB)

    # Numerically-stable log-softmax over the first `action_dim` rows only,
    # implemented with a row mask so the (A+1, TB) tile is written with a
    # single lane-dense (full 128-lane) store.
    row = jax.lax.broadcasted_iota(jnp.int32, yt.shape, dimension=0)
    is_logit = row < action_dim
    logits_masked = jnp.where(is_logit, yt, -jnp.inf)       # value row -> -inf
    m = jnp.max(logits_masked, axis=0, keepdims=True)       # (1, TB), finite (A >= 1)
    e = jnp.exp(logits_masked - m)                          # exp(-inf) = 0 for value row
    lse = jnp.log(jnp.sum(e, axis=0, keepdims=True)) + m

    # logit rows -> log_probs, value row passes through untouched.
    out_ref[...] = jnp.where(is_logit, yt - lse, yt)


def _round_up(n, m):
    return ((n + m - 1) // m) * m


def actor_critic_forward(x, params, *, block_b=8192):
    """x: (B, input_dim) f32. Returns (log_probs (B, action_dim), values (B,))."""
    w1, b1, w2, b2, w3, b3 = params
    B, D = x.shape
    H = w1.shape[1]
    A = w2.shape[1]

    # Fuse actor + critic heads and pre-transpose once (wrapper-side glue) so
    # the kernel runs batch-in-lanes end to end.
    w1t = w1.T                                              # (H, D)
    b1t = b1.reshape(H, 1)                                  # (H, 1)
    w23t = jnp.concatenate([w2, w3], axis=1).T              # (A+1, H)
    b23t = jnp.concatenate([b2, b3], axis=1).reshape(A + 1, 1)
    xt = x.T                                                # (D, B)

    # Batch tile: multiple of 128 lanes.  Prefer the fewest, biggest tiles
    # (per-step overhead dominates this tiny kernel), but keep >= 2 grid steps
    # when the batch spans >= 2 lane-tiles so v7x's two TensorCores both work.
    block_b = max(128, _round_up(block_b, 128))
    b_pad128 = _round_up(B, 128)
    n_tiles = b_pad128 // 128
    if n_tiles <= 1:
        tb = 128
    else:
        tb = min(block_b, 128 * pl.cdiv(n_tiles, 2))
    b_pad = _round_up(b_pad128, tb)
    if b_pad != B:
        xt = jnp.pad(xt, ((0, 0), (0, b_pad - B)))

    grid = (b_pad // tb,)

    flops = 2 * b_pad * (D * H + H * (A + 1)) + b_pad * (H + 2 * (A + 1))
    transcendentals = b_pad * (A + 2)                       # exps + log per row
    bytes_accessed = 4 * (b_pad * D + D * H + H + H * (A + 1) + (A + 1)
                          + b_pad * (A + 1))

    out = pl.pallas_call(
        functools.partial(actor_critic_kernel, action_dim=A),
        out_shape=jax.ShapeDtypeStruct((A + 1, b_pad), jnp.float32),
        grid=grid,
        in_specs=[
            pl.BlockSpec((D, tb), lambda i: (0, i)),        # xT: tiled over batch lanes
            pl.BlockSpec((H, D), lambda i: (0, 0)),         # W1^T: resident
            pl.BlockSpec((H, 1), lambda i: (0, 0)),         # b1^T: resident
            pl.BlockSpec((A + 1, H), lambda i: (0, 0)),     # fused W23^T: resident
            pl.BlockSpec((A + 1, 1), lambda i: (0, 0)),     # fused b23^T: resident
        ],
        out_specs=pl.BlockSpec((A + 1, tb), lambda i: (0, i)),
        compiler_params=pltpu.CompilerParams(
            dimension_semantics=("parallel",)),             # 2 TCs on v7x; free elsewhere
        cost_estimate=pl.CostEstimate(
            flops=flops,
            transcendentals=transcendentals,
            bytes_accessed=bytes_accessed),
    )(xt, w1t, b1t, w23t, b23t)

    log_probs = out[:A, :B].T                               # (B, A)
    values = out[A, :B]                                     # (B,)
    return log_probs, values


def init_params(key, input_dim=4, hidden_dim=64, action_dim=2):
    """Deterministic init mimicking nn.Linear default (uniform +/- 1/sqrt(fan_in))."""
    ks = jax.random.split(key, 6)

    def lin(kw, kb, fan_in, fan_out):
        bound = 1.0 / jnp.sqrt(jnp.float32(fan_in))
        w = jax.random.uniform(kw, (fan_in, fan_out), jnp.float32, -bound, bound)
        b = jax.random.uniform(kb, (1, fan_out), jnp.float32, -bound, bound)
        return w, b

    w1, b1 = lin(ks[0], ks[1], input_dim, hidden_dim)
    w2, b2 = lin(ks[2], ks[3], hidden_dim, action_dim)
    w3, b3 = lin(ks[4], ks[5], hidden_dim, 1)
    return (w1, b1, w2, b2, w3, b3)


if __name__ == "__main__":
    key = jax.random.PRNGKey(0)
    k_x, k_p = jax.random.split(key)

    # B = 200: exercises batch padding (-> 256 lanes) and a 2-step pipelined grid.
    B, input_dim, hidden_dim, action_dim = 200, 4, 64, 2
    x = jax.random.normal(k_x, (B, input_dim), jnp.float32)
    params = init_params(k_p, input_dim, hidden_dim, action_dim)

    fwd = jax.jit(actor_critic_forward)
    log_probs, values = fwd(x, params)
    jax.block_until_ready((log_probs, values))

    # Sanity check against pure-JAX reference.
    w1, b1, w2, b2, w3, b3 = params
    h_ref = jnp.maximum(x @ w1 + b1, 0.0)
    lp_ref = jax.nn.log_softmax(h_ref @ w2 + b2, axis=-1)
    v_ref = (h_ref @ w3 + b3)[:, 0]
    assert log_probs.shape == (B, action_dim) and values.shape == (B,)
    assert jnp.allclose(log_probs, lp_ref, atol=2e-5, rtol=1e-5)
    assert jnp.allclose(values, v_ref, atol=2e-5, rtol=1e-5)

    print("KERNEL_OK")
</pallas_src>

<mosaic_0001>
module attributes {stable_mosaic.version = 11 : i64} {
  func.func @actor_critic_kernel(%arg0: i32, %arg1: memref<4x128xf32, #tpu.memory_space<vmem>>, %arg2: memref<64x4xf32, #tpu.memory_space<vmem>>, %arg3: memref<64x1xf32, #tpu.memory_space<vmem>>, %arg4: memref<3x64xf32, #tpu.memory_space<vmem>>, %arg5: memref<3x1xf32, #tpu.memory_space<vmem>>, %arg6: memref<3x128xf32, #tpu.memory_space<vmem>>) attributes {dimension_semantics = [#tpu.dimension_semantics<parallel>], iteration_bounds = array<i64: 2>, scalar_prefetch = 0 : i64, scratch_operands = 0 : i64, tpu.core_type = #tpu.core_type<tc>, window_params = [{transform_indices = @transform_0, window_bounds = array<i64: 4, 128>}, {pipeline_mode = #tpu.pipeline_mode<synchronous>, transform_indices = @transform_1, window_bounds = array<i64: 64, 4>}, {pipeline_mode = #tpu.pipeline_mode<synchronous>, transform_indices = @transform_2, window_bounds = array<i64: 64, 1>}, {pipeline_mode = #tpu.pipeline_mode<synchronous>, transform_indices = @transform_3, window_bounds = array<i64: 3, 64>}, {pipeline_mode = #tpu.pipeline_mode<synchronous>, transform_indices = @transform_4, window_bounds = array<i64: 3, 1>}, {transform_indices = @transform_5, window_bounds = array<i64: 3, 128>}]} {
    %c0 = arith.constant 0 : index
    %c0_0 = arith.constant 0 : index
    %0 = vector.load %arg1[%c0, %c0_0] : memref<4x128xf32, #tpu.memory_space<vmem>>, vector<4x128xf32>
    %c0_1 = arith.constant 0 : index
    %c0_2 = arith.constant 0 : index
    %1 = vector.load %arg2[%c0_1, %c0_2] : memref<64x4xf32, #tpu.memory_space<vmem>>, vector<64x4xf32>
    %c0_3 = arith.constant 0 : index
    %c0_4 = arith.constant 0 : index
    %2 = vector.load %arg3[%c0_3, %c0_4] : memref<64x1xf32, #tpu.memory_space<vmem>>, vector<64x1xf32>
    %3 = vector.extract_strided_slice %1 {offsets = [0, 0], sizes = [64, 1], strides = [1, 1]} : vector<64x4xf32> to vector<64x1xf32>
    %4 = vector.extract_strided_slice %0 {offsets = [0, 0], sizes = [1, 128], strides = [1, 1]} : vector<4x128xf32> to vector<1x128xf32>
    %5 = vector.broadcast %3 : vector<64x1xf32> to vector<64x128xf32>
    %6 = vector.broadcast %4 : vector<1x128xf32> to vector<64x128xf32>
    %7 = arith.mulf %5, %6 : vector<64x128xf32>
    %8 = vector.broadcast %2 : vector<64x1xf32> to vector<64x128xf32>
    %9 = arith.addf %8, %7 : vector<64x128xf32>
    %10 = vector.extract_strided_slice %1 {offsets = [0, 1], sizes = [64, 1], strides = [1, 1]} : vector<64x4xf32> to vector<64x1xf32>
    %11 = vector.extract_strided_slice %0 {offsets = [1, 0], sizes = [1, 128], strides = [1, 1]} : vector<4x128xf32> to vector<1x128xf32>
    %12 = vector.broadcast %10 : vector<64x1xf32> to vector<64x128xf32>
    %13 = vector.broadcast %11 : vector<1x128xf32> to vector<64x128xf32>
    %14 = arith.mulf %12, %13 : vector<64x128xf32>
    %15 = arith.addf %9, %14 : vector<64x128xf32>
    %16 = vector.extract_strided_slice %1 {offsets = [0, 2], sizes = [64, 1], strides = [1, 1]} : vector<64x4xf32> to vector<64x1xf32>
    %17 = vector.extract_strided_slice %0 {offsets = [2, 0], sizes = [1, 128], strides = [1, 1]} : vector<4x128xf32> to vector<1x128xf32>
    %18 = vector.broadcast %16 : vector<64x1xf32> to vector<64x128xf32>
    %19 = vector.broadcast %17 : vector<1x128xf32> to vector<64x128xf32>
    %20 = arith.mulf %18, %19 : vector<64x128xf32>
    %21 = arith.addf %15, %20 : vector<64x128xf32>
    %22 = vector.extract_strided_slice %1 {offsets = [0, 3], sizes = [64, 1], strides = [1, 1]} : vector<64x4xf32> to vector<64x1xf32>
    %23 = vector.extract_strided_slice %0 {offsets = [3, 0], sizes = [1, 128], strides = [1, 1]} : vector<4x128xf32> to vector<1x128xf32>
    %24 = vector.broadcast %22 : vector<64x1xf32> to vector<64x128xf32>
    %25 = vector.broadcast %23 : vector<1x128xf32> to vector<64x128xf32>
    %26 = arith.mulf %24, %25 : vector<64x128xf32>
    %27 = arith.addf %21, %26 : vector<64x128xf32>
    %cst = arith.constant 0.000000e+00 : f32
    %28 = vector.broadcast %cst : f32 to vector<64x128xf32>
    %29 = arith.maximumf %27, %28 : vector<64x128xf32>
    %c0_5 = arith.constant 0 : index
    %c0_6 = arith.constant 0 : index
    %30 = vector.load %arg4[%c0_5, %c0_6] : memref<3x64xf32, #tpu.memory_space<vmem>>, vector<3x64xf32>
    %cst_7 = arith.constant dense<0.000000e+00> : vector<3x128xf32>
    %31 = tpu.matmul %30, %29, %cst_7 {dimension_numbers = #tpu.dot_dimension_numbers<[1], [0], [0], [1], [0, 0, 1, 1], [], []>} : vector<3x64xf32>, vector<64x128xf32>, vector<3x128xf32> -> vector<3x128xf32>
    %c0_8 = arith.constant 0 : index
    %c0_9 = arith.constant 0 : index
    %32 = vector.load %arg5[%c0_8, %c0_9] : memref<3x1xf32, #tpu.memory_space<vmem>>, vector<3x1xf32>
    %33 = vector.broadcast %32 : vector<3x1xf32> to vector<3x128xf32>
    %34 = arith.addf %31, %33 : vector<3x128xf32>
    %35 = tpu.iota {dimensions = array<i32: 0>} : vector<3x128xi32>
    %c2_i32 = arith.constant 2 : i32
    %36 = vector.broadcast %c2_i32 : i32 to vector<3x128xi32>
    %37 = arith.cmpi slt, %35, %36 : vector<3x128xi32>
    %cst_10 = arith.constant 0xFF800000 : f32
    %38 = vector.broadcast %cst_10 : f32 to vector<3x128xf32>
    %39 = arith.select %37, %34, %38 : vector<3x128xi1>, vector<3x128xf32>
    %cst_11 = arith.constant dense<0xFF800000> : vector<128xf32>
    %40 = vector.multi_reduction <maximumf>, %39, %cst_11 [0] : vector<3x128xf32> to vector<128xf32>
    %41 = vector.shape_cast %40 : vector<128xf32> to vector<1x128xf32>
    %42 = vector.broadcast %41 : vector<1x128xf32> to vector<3x128xf32>
    %43 = arith.subf %39, %42 : vector<3x128xf32>
    %44 = math.exp %43 : vector<3x128xf32>
    %cst_12 = arith.constant dense<0.000000e+00> : vector<128xf32>
    %45 = vector.multi_reduction <add>, %44, %cst_12 [0] : vector<3x128xf32> to vector<128xf32>
    %46 = vector.shape_cast %45 : vector<128xf32> to vector<1x128xf32>
    %47 = math.log %46 : vector<1x128xf32>
    %48 = arith.addf %47, %41 : vector<1x128xf32>
    %49 = vector.broadcast %48 : vector<1x128xf32> to vector<3x128xf32>
    %50 = arith.subf %34, %49 : vector<3x128xf32>
    %51 = arith.select %37, %50, %34 : vector<3x128xi1>, vector<3x128xf32>
    %c0_13 = arith.constant 0 : index
    %c0_14 = arith.constant 0 : index
    %52 = vector.load %arg6[%c0_13, %c0_14] : memref<3x128xf32, #tpu.memory_space<vmem>>, vector<3x128xf32>
    tpu.vector_store %arg6[%c0_13, %c0_14], %51 {strides = array<i32>} : memref<3x128xf32, #tpu.memory_space<vmem>>, vector<3x128xf32>,
    return
  }
  func.func @transform_0(%arg0: i32) -> (i32, i32) {
    %c0_i32 = arith.constant 0 : i32
    %c0_i32_0 = arith.constant 0 : i32
    return %c0_i32, %arg0 : i32, i32
  }
  func.func @transform_1(%arg0: i32) -> (i32, i32) {
    %c0_i32 = arith.constant 0 : i32
    %c0_i32_0 = arith.constant 0 : i32
    %c0_i32_1 = arith.constant 0 : i32
    return %c0_i32, %c0_i32_0 : i32, i32
  }
  func.func @transform_2(%arg0: i32) -> (i32, i32) {
    %c0_i32 = arith.constant 0 : i32
    %c0_i32_0 = arith.constant 0 : i32
    %c0_i32_1 = arith.constant 0 : i32
    return %c0_i32, %c0_i32_0 : i32, i32
  }
  func.func @transform_3(%arg0: i32) -> (i32, i32) {
    %c0_i32 = arith.constant 0 : i32
    %c0_i32_0 = arith.constant 0 : i32
    %c0_i32_1 = arith.constant 0 : i32
    return %c0_i32, %c0_i32_0 : i32, i32
  }
  func.func @transform_4(%arg0: i32) -> (i32, i32) {
    %c0_i32 = arith.constant 0 : i32
    %c0_i32_0 = arith.constant 0 : i32
    %c0_i32_1 = arith.constant 0 : i32
    return %c0_i32, %c0_i32_0 : i32, i32
  }
  func.func @transform_5(%arg0: i32) -> (i32, i32) {
    %c0_i32 = arith.constant 0 : i32
    %c0_i32_0 = arith.constant 0 : i32
    return %c0_i32, %arg0 : i32, i32
  }
}

</mosaic_0001>

<bundles_post_ra>
// kernel: actor_critic_forward.1
= control target key start
LH: loop header
LB: loop body
LE: loop exit
PB: predicated region body
PF: predicated region fallthrough
CT: control target
= control target key end

     0   :  { %s701_s18 = smov 0   ;;  %s866_s0 = inlined_call_operand.vmem [shape: f32[4,256], index: 0, kind: input, shape index: {}]   ;;  %s867_s1 = inlined_call_operand.vmem [shape: f32[64,4], index: 1, kind: input, shape index: {}]   ;;  %s868_s2 = inlined_call_operand.vmem [shape: f32[64,1], index: 2, kind: input, shape index: {}]   ;;  %s869_s3 = inlined_call_operand.vmem [shape: f32[3,64], index: 3, kind: input, shape index: {}]   ;;  %s870_s4 = inlined_call_operand.vmem [shape: f32[3,1], index: 4, kind: input, shape index: {}]   ;;  %s871_s5 = inlined_call_operand.vmem [shape: f32[3,256], index: 5, kind: output, shape index: {}]  }
   0x1 LB: > { %s601_s19 = sadd.s32 4294967295, %s665_s18   ;;  %p605_p0 = scmp.ge.s32.totalorder %s665_s18, 1  ;;  %s665_s18 = sphi %s701_s18, %s15_s18  }
   0x2   : > { %p186_p1 = scmp.lt.s32.totalorder %s665_s18, 3 }
   0x4   : > { %p187_p2 = pnand %p605_p0, %p186_p1 }
   0x5   : > { %p212_p3 = scmp.lt.s32.totalorder (!%p187_p2), %s601_s19, 1 }
   0x6   : > { %190 = sbr.rel (%p187_p2) target bundleno = 443 (0x1bb), region = 40 }
   0xb   : > { %v236_v0 = vld [vmem:[%s868_s2 + $0x38] sm:$0xff]  ;;  %v227_v1 = vld [vmem:[%s867_s1 + $0x30] sm:$0xff]  ;;  %v667_v2 = vmov 1   ;;  %v668_v3 = vmov 0   ;;  %v226_v4 = vld [vmem:[%s867_s1 + $0x28] sm:$0xff]  ;;  %v669_v8 = vmov 2  }
   0xc   : > { %626 = vset.pattern.permute.xlu0 %v667_v2  ;;  %623 = vset.pattern.permute.xlu1 %v668_v3  ;;  %v228_v5 = vld [vmem:[%s867_s1 + $0x38] sm:$0xff]  ;;  %v235_v6 = vld [vmem:[%s868_s2 + $0x30] sm:$0xff]  ;;  %v225_v7 = vld [vmem:[%s867_s1 + $0x20] sm:$0xff]  ;;  %v670_v13 = vmov 3   ;;  %s873_s19 = smov (!%p212_p3, %s601_s19), 1  ;;  %vm496_vm0 = vcmask 523264  }
   0xd   : > { %323 = vperm.xlu1 %623, %v236_v0   ;;  %359 = vperm.xlu0 %626, %v227_v1   ;;  %v232_v9 = vld [vmem:[%s868_s2 + $0x18] sm:$0xff]  ;;  %v234_v10 = vld [vmem:[%s868_s2 + $0x28] sm:$0xff]  ;;  %v231_v11 = vld [vmem:[%s868_s2 + $0x10] sm:$0xff]  ;;  %s606_s29 = sshll.u32 %s873_s19, 2  ;;  %vm524_vm2 = vcmask 1042432  }
   0xe   : > { %625 = vset.pattern.permute.xlu2 %v668_v3  ;;  %v224_v12 = vld [vmem:[%s867_s1 + $0x18] sm:$0xff]  ;;  %v233_v14 = vld [vmem:[%s868_s2 + $0x20] sm:$0xff]  ;;  %v223_v15 = vld [vmem:[%s867_s1 + $0x10] sm:$0xff]  ;;  %s215_s7 = scalar_lea.vmem %s866_s0, %s606_s29  ;;  %s219_s14 = scalar_lea.vmem %s871_s5, %s606_s29 }
   0xf   : > { %264 = vperm.xlu2 %625, %v226_v4   ;;  %v222_v16 = vld [vmem:[%s867_s1 + $0x8] sm:$0xff]  ;;  %v221_v17 = vld [vmem:[%s867_s1] sm:$0xff] }
  0x10   : > { %v230_v18 = vld [vmem:[%s868_s2 + $0x8] sm:$0xff]  ;;  %v229_v21 = vld [vmem:[%s868_s2] sm:$0xff] }
  0x11   : > { %v220_v31 = vld [vmem:[%s215_s7] sm:$0xf] }
  0x12   : > { %v803_v32 = vperm.slane %v220_v31, 0  ;;  %v806_v37 = vperm.slane %v220_v31, 1  ;;  %v808_v38 = vperm.slane %v220_v31, 2  ;;  %v814_v43 = vperm.slane %v220_v31, 3 }
  0x15   : > { %624 = vset.pattern.permute.xlu1 %v667_v2  ;;  %627 = vset.pattern.permute.xlu0 %v668_v3 }
  0x16   : > { %363 = vperm.xlu1 %624, %v228_v5   ;;  %274 = vperm.xlu0 %627, %v228_v5  }
  0x17   : > { %318 = vperm.xlu2 %625, %v235_v6  }
  0x1e   : > { %628 = vset.pattern.permute.xlu1 %v669_v8  ;;  %269 = vperm.xlu0 %627, %v227_v1  }
  0x1f   : > { %412 = vperm.xlu1 %628, %v228_v5   ;;  %259 = vperm.xlu2 %625, %v225_v7  }
  0x26   : > { %303 = vperm.xlu0 %627, %v232_v9  }
  0x27   : > { %629 = vset.pattern.permute.xlu1 %v668_v3  ;;  %630 = vset.pattern.permute.xlu2 %v667_v2 }
  0x28   : > { %313 = vperm.xlu1 %629, %v234_v10   ;;  %355 = vperm.xlu2 %630, %v226_v4  }
  0x2e   : > { %298 = vperm.xlu0 %627, %v231_v11  }
  0x30   : > { %631 = vset.pattern.permute.xlu1 %v670_v13  ;;  %632 = vset.pattern.permute.xlu2 %v668_v3 }
  0x31   : > { %461 = vperm.xlu1 %631, %v228_v5   ;;  %254 = vperm.xlu2 %632, %v224_v12  }
  0x36   : > { %643 = vset.pattern.permute.xlu0 %v670_v13 }
  0x37   : > { %449 = vperm.xlu0 %643, %v225_v7  }
  0x39   : > { %633 = vset.pattern.permute.xlu1 %v668_v3  ;;  %634 = vset.pattern.permute.xlu2 %v667_v2 }
  0x3a   : > { %308 = vperm.xlu1 %633, %v233_v14   ;;  %351 = vperm.xlu2 %634, %v225_v7  }
  0x3f   : > { %445 = vperm.xlu0 %643, %v224_v12  }
  0x42   : > { %635 = vset.pattern.permute.xlu1 %v670_v13  ;;  %636 = vset.pattern.permute.xlu2 %v668_v3 }
  0x43   : > { %457 = vperm.xlu1 %635, %v227_v1   ;;  %249 = vperm.xlu2 %636, %v223_v15  }
  0x47   : > { %648 = vset.pattern.permute.xlu0 %v669_v8 }
  0x48   : > { %408 = vperm.xlu0 %648, %v227_v1  }
  0x4b   : > { %637 = vset.pattern.permute.xlu1 %v667_v2  ;;  %638 = vset.pattern.permute.xlu2 %v669_v8 }
  0x4c   : > { %347 = vperm.xlu1 %637, %v224_v12   ;;  %400 = vperm.xlu2 %638, %v225_v7  }
  0x50   : > { %404 = vperm.xlu0 %648, %v226_v4  }
  0x54   : > { %639 = vset.pattern.permute.xlu1 %v670_v13  ;;  %640 = vset.pattern.permute.xlu2 %v668_v3 }
  0x55   : > { %453 = vperm.xlu1 %639, %v226_v4   ;;  %244 = vperm.xlu2 %640, %v222_v16  }
  0x58   : > { %388 = vperm.xlu0 %648, %v222_v16  }
  0x5d   : > { %641 = vset.pattern.permute.xlu1 %v667_v2  ;;  %642 = vset.pattern.permute.xlu2 %v669_v8 }
  0x5e   : > { %343 = vperm.xlu1 %641, %v223_v15   ;;  %396 = vperm.xlu2 %642, %v224_v12  }
  0x60   : > { %654 = vset.pattern.permute.xlu0 %v668_v3 }
  0x66   : > { %644 = vset.pattern.permute.xlu1 %v668_v3  ;;  %645 = vset.pattern.permute.xlu2 %v668_v3 }
  0x67   : > { %239 = vperm.xlu1 %644, %v221_v17   ;;  %293 = vperm.xlu2 %645, %v230_v18  }
  0x69   : > { %v779_v19 = vpop.permute.xlu2 %264 }
  0x6a   : > { %v283_v7 = vmul.f32 %v803_v32, %v779_v19 }
  0x6f   : > { %646 = vset.pattern.permute.xlu1 %v667_v2  ;;  %647 = vset.pattern.permute.xlu2 %v669_v8 }
  0x70   : > { %339 = vperm.xlu1 %646, %v222_v16   ;;  %392 = vperm.xlu2 %647, %v223_v15  }
  0x71   : > { %v319_v20 = vpop.permute.xlu2 %318 }
  0x78   : > { %649 = vset.pattern.permute.xlu1 %v668_v3  ;;  %650 = vset.pattern.permute.xlu2 %v667_v2 }
  0x79   : > { %288 = vperm.xlu1 %649, %v229_v21   ;;  %335 = vperm.xlu2 %650, %v221_v17   ;;  %v260_v22 = vpop.permute.xlu2 %259 }
  0x7a   : > { %v282_v63 = vmul.f32 %v803_v32, %v260_v22 }
  0x7f   : > { %v324_v23 = vpop.permute.xlu1 %323  ;;  %v360_v24 = vpop.permute.xlu0 %359 }
  0x80   : > { %v373_v57 = vmul.f32 %v806_v37, %v360_v24 }
  0x81   : > { %651 = vset.pattern.permute.xlu1 %v670_v13  ;;  %652 = vset.pattern.permute.xlu2 %v669_v8 }
  0x82   : > { %441 = vperm.xlu1 %651, %v223_v15   ;;  %384 = vperm.xlu2 %652, %v221_v17   ;;  %v356_v25 = vpop.permute.xlu2 %355 }
  0x83   : > { %v372_v9 = vmul.f32 %v806_v37, %v356_v25 }
  0x88   : > { %v364_v26 = vpop.permute.xlu1 %363  ;;  %v275_v27 = vpop.permute.xlu0 %274 }
  0x89   : > { %v285_v34 = vmul.f32 %v803_v32, %v275_v27  ;;  %v374_v40 = vmul.f32 %v806_v37, %v364_v26 }
  0x8a   : > { %437 = vperm.xlu1 %651, %v222_v16   ;;  %653 = vset.pattern.permute.xlu2 %v670_v13 }
  0x8b   : > { %433 = vperm.xlu2 %653, %v221_v17   ;;  %v255_v30 = vpop.permute.xlu2 %254  ;;  %v333_v39 = vadd.f32 %v324_v23, %v285_v34 }
  0x8c   : > { %v281_v2 = vmul.f32 %v803_v32, %v255_v30 }
  0x8d   : > { %v382_v44 = vadd.f32 %v374_v40, %v333_v39 }
  0x90   : > { %v270_v28 = vpop.permute.xlu0 %269 }
  0x91   : > { %v413_v29 = vpop.permute.xlu1 %412  ;;  %v284_v55 = vmul.f32 %v803_v32, %v270_v28 }
  0x92   : > { %v423_v41 = vmul.f32 %v808_v38, %v413_v29 }
  0x93   : > { %v332_v58 = vadd.f32 %v319_v20, %v284_v55 }
  0x94   : > { %v352_v36 = vpop.permute.xlu2 %351  ;;  %v431_v47 = vadd.f32 %v423_v41, %v382_v44 }
  0x95   : > { %v381_v61 = vadd.f32 %v373_v57, %v332_v58  ;;  %v371_v3 = vmul.f32 %v806_v37, %v352_v36 }
  0x98   : > { %v304_v33 = vpop.permute.xlu0 %303 }
  0x99   : > { %v329_v13 = vadd.f32 %v304_v33, %v281_v2 }
  0x9a   : > { %v314_v35 = vpop.permute.xlu1 %313 }
  0x9b   : > { %v331_v12 = vadd.f32 %v314_v35, %v283_v7 }
  0x9d   : > { %v817_v48 = vpop.permute.xlu2 %249  ;;  %v380_v21 = vadd.f32 %v372_v9, %v331_v12  ;;  %v489_v12 = vld [vmem:[%s869_s3] sm:$0x7] }
  0xa0   : > { %v812_v42 = vpop.permute.xlu0 %298 }
  0xa3   : > { %v462_v45 = vpop.permute.xlu1 %461 }
  0xa4   : > { %v472_v46 = vmul.f32 %v814_v43, %v462_v45  ;;  %v490_v45 = vld [vmem:[%s870_s4] sm:$0x7] }
  0xa5   : > { %493 = vperm.xlu0 %654, %v490_v45  }
  0xa6   : > { %v480_v49 = vadd.f32 %v472_v46, %v431_v47  ;;  %v401_v53 = vpop.permute.xlu2 %400  ;;  %v280_v46 = vmul.f32 %v803_v32, %v817_v48 }
  0xa7   : > { %v420_v15 = vmul.f32 %v808_v38, %v401_v53 }
  0xa8   : > { %v488_v50 = vmax.f32 %v480_v49, 0.0 }
  0xa9   : > { %v450_v51 = vpop.permute.xlu0 %449 }
  0xaa   : > { %508 = vmatpush.msra.mxu0 %v488_v50  ;;  %v469_v19 = vmul.f32 %v814_v43, %v450_v51  ;;  %v328_v51 = vadd.f32 %v812_v42, %v280_v46 }
  0xac   : > { %v309_v52 = vpop.permute.xlu1 %308 }
  0xad   : > { %v330_v4 = vadd.f32 %v309_v52, %v282_v63 }
  0xaf   : > { %v245_v59 = vpop.permute.xlu2 %244  ;;  %v379_v14 = vadd.f32 %v371_v3, %v330_v4 }
  0xb0   : > { %v279_v55 = vmul.f32 %v803_v32, %v245_v59 }
  0xb1   : > { %v446_v54 = vpop.permute.xlu0 %445  ;;  %v428_v22 = vadd.f32 %v420_v15, %v379_v14 }
  0xb2   : > { %v468_v24 = vmul.f32 %v814_v43, %v446_v54 }
  0xb3   : > { %v477_v29 = vadd.f32 %v469_v19, %v428_v22 }
  0xb5   : > { %v458_v56 = vpop.permute.xlu1 %457  ;;  %v485_v33 = vmax.f32 %v477_v29, 0.0 }
  0xb6   : > { %v471_v0 = vmul.f32 %v814_v43, %v458_v56 }
  0xb8   : > { %v397_v10 = vpop.permute.xlu2 %396 }
  0xb9   : > { %v419_v18 = vmul.f32 %v808_v38, %v397_v10 }
  0xba   : > { %v409_v60 = vpop.permute.xlu0 %408 }
  0xbb   : > { %v422_v62 = vmul.f32 %v808_v38, %v409_v60 }
  0xbd   : > { %v430_v1 = vadd.f32 %v422_v62, %v381_v61 }
  0xbe   : > { %v348_v5 = vpop.permute.xlu1 %347 }
  0xbf   : > { %v479_v6 = vadd.f32 %v471_v0, %v430_v1  ;;  %v370_v8 = vmul.f32 %v806_v37, %v348_v5 }
  0xc1   : > { %v487_v11 = vmax.f32 %v479_v6, 0.0  ;;  %v378_v17 = vadd.f32 %v370_v8, %v329_v13  ;;  %v294_v36 = vpop.permute.xlu2 %293 }
  0xc2   : > { %v405_v16 = vpop.permute.xlu0 %404  ;;  %v327_v63 = vadd.f32 %v294_v36, %v279_v55 }
  0xc3   : > { %509 = vmatpush.msra.mxu0 %v487_v11  ;;  %v421_v20 = vmul.f32 %v808_v38, %v405_v16  ;;  %v427_v25 = vadd.f32 %v419_v18, %v378_v17 }
  0xc5   : > { %v429_v26 = vadd.f32 %v421_v20, %v380_v21  ;;  %v476_v31 = vadd.f32 %v468_v24, %v427_v25 }
  0xc7   : > { %v454_v23 = vpop.permute.xlu1 %453  ;;  %v484_v35 = vmax.f32 %v476_v31, 0.0 }
  0xc8   : > { %v470_v27 = vmul.f32 %v814_v43, %v454_v23 }
  0xca   : > { %v478_v28 = vadd.f32 %v470_v27, %v429_v26  ;;  %v393_v40 = vpop.permute.xlu2 %392  ;;  %v389_v62 = vpop.permute.xlu0 %388 }
  0xcb   : > { %v418_v53 = vmul.f32 %v808_v38, %v393_v40  ;;  %v417_v4 = vmul.f32 %v808_v38, %v389_v62 }
  0xcc   : > { %v486_v30 = vmax.f32 %v478_v28, 0.0 }
  0xce   : > { %510 = vmatpush.msra.mxu0 %v486_v30 }
  0xd0   : > { %v344_v34 = vpop.permute.xlu1 %343  ;;  %511 = vmatpush.msra.mxu0 %v485_v33 }
  0xd1   : > { %v369_v49 = vmul.f32 %v806_v37, %v344_v34 }
  0xd2   : > { %512 = vmatpush.msra.mxu0 %v484_v35 }
  0xd3   : > { %v336_v44 = vpop.permute.xlu2 %335  ;;  %v377_v52 = vadd.f32 %v369_v49, %v328_v51 }
  0xd4   : > { %v367_v56 = vmul.f32 %v806_v37, %v336_v44 }
  0xd5   : > { %v426_v60 = vadd.f32 %v418_v53, %v377_v52 }
  0xd9   : > { %v240_v39 = vpop.permute.xlu1 %239 }
  0xda   : > { %v278_v54 = vmul.f32 %v803_v32, %v240_v39 }
  0xdc   : > { %v385_v50 = vpop.permute.xlu2 %384 }
  0xdd   : > { %v416_v42 = vmul.f32 %v808_v38, %v385_v50  ;;  %v520_v38 = vlaneseq }
  0xdf   : > { %v521_v13 = vshrl.u32 %v520_v38, 7 }
  0xe1   : > { %vm522_vm1 = vcmp.lt.s32.totalorder %v521_v13, 2 }
  0xe2   : > { %v340_v41 = vpop.permute.xlu1 %339 }
  0xe3   : > { %v368_v48 = vmul.f32 %v806_v37, %v340_v41 }
  0xe5   : > { %v434_v2 = vpop.permute.xlu2 %433  ;;  %v376_v3 = vadd.f32 %v368_v48, %v327_v63 }
  0xe6   : > { %v465_v59 = vmul.f32 %v814_v43, %v434_v2 }
  0xe7   : > { %v425_v7 = vadd.f32 %v417_v4, %v376_v3 }
  0xeb   : > { %v289_v47 = vpop.permute.xlu1 %288 }
  0xec   : > { %v326_v57 = vadd.f32 %v289_v47, %v278_v54 }
  0xee   : > { %v375_v0 = vadd.f32 %v367_v56, %v326_v57 }
  0xf0   : > { %v424_v5 = vadd.f32 %v416_v42, %v375_v0 }
  0xf2   : > { %v473_v9 = vadd.f32 %v465_v59, %v424_v5 }
  0xf4   : > { %v442_v58 = vpop.permute.xlu1 %441  ;;  %v481_v11 = vmax.f32 %v473_v9, 0.0 }
  0xf5   : > { %v467_v61 = vmul.f32 %v814_v43, %v442_v58 }
  0xf7   : > { %v475_v1 = vadd.f32 %v467_v61, %v426_v60 }
  0xf9   : > { %v483_v32 = vmax.f32 %v475_v1, 0.0 }
  0xfb   : > { %513 = vmatpush.msra.mxu0 %v483_v32 }
  0xfc   : > { %v438_v6 = vpop.permute.xlu1 %437 }
  0xfd   : > { %v466_v37 = vmul.f32 %v814_v43, %v438_v6 }
  0xff   : > { %v474_v8 = vadd.f32 %v466_v37, %v425_v7 }
 0x101   : > { %v482_v10 = vmax.f32 %v474_v8, 0.0 }
 0x103   : > { %514 = vmatpush.msra.mxu0 %v482_v10 }
 0x105   : > { %515 = vmatpush.msra.mxu0 %v481_v11 }
 0x106   : > { %608 = vmatmul.msk.f32.vlgmr.msra.gmra.mxu0 %vm496_vm0, %v489_v12 }
 0x117   : > { %v494_v14 = vpop.permute.xlu0 %493 }
 0x183   : > { %v517_v15 = vpop.f32.mrf.mxu0 }
 0x184   : > { %v518_v16 = vadd.f32 %v517_v15, %v494_v14 }
 0x186   : > { %v523_v43 = vsel %vm522_vm1, %v518_v16, -inf }
 0x187   : > { %v525_v17 = vsel %vm524_vm2, %v523_v43, -inf }
 0x188   : > { %v526_v18 = vrot.slane %v525_v17, 4 }
 0x18a   : > { %v527_v20 = vmax.f32 %v525_v17, %v526_v18 }
 0x18c   : > { %v528_v21 = vrot.slane %v527_v20, 2 }
 0x18e   : > { %v529_v19 = vmax.f32 %v527_v20, %v528_v21 }
 0x190   : > { %v530_v22 = vrot.slane %v529_v19, 1 }
 0x192   : > { %v531_v23 = vmax.f32 %v529_v19, %v530_v22 }
 0x194   : > { %v532_v24 = vsub.f32 %v523_v43, %v531_v23 }
 0x196   : > { %v533_v25 = vmul.f32 1.442695, %v532_v24 }
 0x198   : > { %655 = vpow2.f32 %v533_v25 }
 0x19e   : > { %v656_v26 = vpop.eup %655 }
 0x19f   : > { %v535_v27 = vsel %vm524_vm2, %v656_v26, 0.0 }
 0x1a0   : > { %v536_v28 = vrot.slane %v535_v27, 4 }
 0x1a2   : > { %v537_v29 = vadd.f32 %v536_v28, %v535_v27 }
 0x1a4   : > { %v538_v30 = vrot.slane %v537_v29, 2 }
 0x1a6   : > { %v539_v31 = vadd.f32 %v538_v30, %v537_v29 }
 0x1a8   : > { %v540_v33 = vrot.slane %v539_v31, 1 }
 0x1aa   : > { %v541_v34 = vadd.f32 %v540_v33, %v539_v31 }
 0x1ac   : > { %657 = vlog2.f32 %v541_v34 }
 0x1b2   : > { %v658_v35 = vpop.eup %657 }
 0x1b3   : > { %v543_v36 = vmul.f32 0.6931472, %v658_v35 }
 0x1b5   : > { %v544_v39 = vadd.f32 %v543_v36, %v531_v23 }
 0x1b7   : > { %v545_v40 = vsub.f32 %v518_v16, %v544_v39 }
 0x1b9   : > { %v546_v41 = vsel %vm522_vm1, %v545_v40, %v518_v16 }
 0x1ba   : > { %547 = vst [vmem:[%s219_s14] sm:$0x7] %v546_v41 }
 0x1bb PF: > { %s15_s18 = sadd.s32 1, %s665_s18  }
 0x1bc   : > { %p12_p4 = scmp.ge.s32.totalorder %s15_s18, 4  }
 0x1be   :  { %14 = sbr.rel (!%p12_p4) target bundleno = 1 (0x1), region = 70 }

</bundles_post_ra>
